<compile_context>
chip_gen: v7x
topology: tpu7x:2x2x1
jax: 0.10.0
libtpu: 0.0.40
codegen_flags: <defaults>
</compile_context>

<pallas_src>
import jax
import jax.numpy as jnp
from jax.experimental import pallas as pl
from jax.experimental.pallas import tpu as pltpu

_LANE = 128
_MAX_BLOCK_ROWS = 1024  # 1024 x 128 x 4B = 512 KiB/block (f32); fits every gen.


def _lshr32(x, k):
    """Logical right shift for int32 (arithmetic shift + mask of the top bits)."""
    return (x >> k) & ((1 << (32 - k)) - 1)


def _hash32(x):
    """lowbias32 avalanche hash on int32 (wrap-around arithmetic)."""
    x = x ^ _lshr32(x, 16)
    x = x * 2145916205          # 0x7feb352d
    x = x ^ _lshr32(x, 15)
    x = x * (-2073188725)       # 0x846ca68b wrapped to int32
    x = x ^ _lshr32(x, 16)
    return x


def _bits_to_unit_open(h):
    """Hashed int32 -> float32 uniform in (0, 1] (24 mantissa-exact bits)."""
    m = _lshr32(h, 8)  # 24 random bits in [0, 2^24)
    return (m.astype(jnp.float32) + 1.0) * jnp.float32(1.0 / 16777216.0)


def _gaussian_noise_kernel(seed_ref, x_ref, o_ref):
    rows, lanes = x_ref.shape
    # Global linear element index for this tile -> counter-based RNG: different
    # tiles automatically draw different noise from the same scalar seed.
    row0 = pl.program_id(0) * rows
    rid = jax.lax.broadcasted_iota(jnp.int32, (rows, lanes), 0) + row0
    lid = jax.lax.broadcasted_iota(jnp.int32, (rows, lanes), 1)
    idx = rid * lanes + lid

    seed = seed_ref[0]
    base = _hash32(idx ^ _hash32(seed))
    u1 = _bits_to_unit_open(_hash32(base ^ 1297109143))   # stream 1
    u2 = _bits_to_unit_open(_hash32(base ^ 2027808487))   # stream 2

    # Box-Muller -> standard normal (matches torch.randn_like). log/sqrt/cos
    # run on the EUP/VPU; the op stays HBM-bound.
    r = jnp.sqrt(-2.0 * jnp.log(u1))
    z = r * jnp.cos(jnp.float32(6.283185307179586) * u2)

    # (randn - 0.5) / 10  ==  z * 0.1 - 0.05  (strength-reduced, f32 constants)
    noise = z * jnp.float32(0.1) - jnp.float32(0.05)
    o_ref[...] = x_ref[...] + noise.astype(o_ref.dtype)


def gaussian_noise_layer(x, seed, training=True):
    """Pallas implementation of GaussianNoiseLayer.forward.

    x: any-shape array (NCHW in the reference net). seed: int32 PRNG seed
    (stand-in for torch's global RNG state). training: mirrors Module.training.
    """
    if not training:
        return x

    orig_shape = x.shape
    total = x.size

    # Lane-dense (rows, 128) view in the NATIVE dtype. No upcast; padding only
    # on the (rare) non-multiple-of-128 tail.
    pad = (-total) % _LANE
    x_flat = x.reshape(-1)
    if pad:
        # TODO(synk): tail padding costs one extra HBM pass; typical conv
        # feature maps (C*H*W % 128 == 0) take the pad-free fast path.
        x_flat = jnp.pad(x_flat, (0, pad))
    rows = x_flat.shape[0] // _LANE
    x2d = x_flat.reshape(rows, _LANE)

    # Tile rows: biggest block <= _MAX_BLOCK_ROWS; full-rows block for small
    # inputs (satisfies the (8,128) rule via "equal to the full array dim").
    block_rows = rows if rows <= _MAX_BLOCK_ROWS else _MAX_BLOCK_ROWS
    grid = (pl.cdiv(rows, block_rows),)

    seed_arr = jnp.asarray([seed], dtype=jnp.int32)

    out2d = pl.pallas_call(
        _gaussian_noise_kernel,
        out_shape=jax.ShapeDtypeStruct(x2d.shape, x2d.dtype),
        grid=grid,
        in_specs=[
            pl.BlockSpec(memory_space=pltpu.SMEM),               # seed scalar
            pl.BlockSpec((block_rows, _LANE), lambda i: (i, 0)),  # x tile
        ],
        out_specs=pl.BlockSpec((block_rows, _LANE), lambda i: (i, 0)),
        input_output_aliases={1: 0},   # elementwise, in-place safe
        compiler_params=pltpu.CompilerParams(
            dimension_semantics=("parallel",)),
    )(seed_arr, x2d)

    out = out2d.reshape(-1)
    if pad:
        out = out[:total]
    return out.reshape(orig_shape)


if __name__ == "__main__":
    key = jax.random.PRNGKey(0)
    x = jax.random.normal(key, (2, 4, 16, 16), dtype=jnp.float32)  # NCHW

    # Training mode: x + (N(0,1) - 0.5) / 10
    y = gaussian_noise_layer(x, seed=42, training=True)
    jax.block_until_ready(y)
    assert y.shape == x.shape and y.dtype == x.dtype

    delta = y - x
    max_abs = float(jnp.max(jnp.abs(delta)))
    assert 0.0 < max_abs < 1.0                      # small, nonzero perturbation
    assert 0.03 < float(jnp.std(delta)) < 0.3       # std ~ 0.1
    assert -0.12 < float(jnp.mean(delta)) < 0.02    # mean ~ -0.05

    # Determinism: same seed -> identical noise.
    y2 = gaussian_noise_layer(x, seed=42, training=True)
    assert bool(jnp.all(y2 == y))

    # Eval mode: identity.
    y_eval = gaussian_noise_layer(x, seed=42, training=False)
    jax.block_until_ready(y_eval)
    assert bool(jnp.all(y_eval == x))

    print("KERNEL_OK")
</pallas_src>

<mosaic_0001>
module attributes {stable_mosaic.version = 11 : i64} {
  func.func @_gaussian_noise_kernel(%arg0: i32, %arg1: memref<1xi32, #tpu.memory_space<smem>>, %arg2: memref<16x128xf32, #tpu.memory_space<vmem>>, %arg3: memref<16x128xf32, #tpu.memory_space<vmem>>) attributes {dimension_semantics = [#tpu.dimension_semantics<parallel>], iteration_bounds = array<i64: 1>, scalar_prefetch = 0 : i64, scratch_operands = 0 : i64, tpu.core_type = #tpu.core_type<tc>, window_params = [{transform_indices = @transform_0, window_bounds = array<i64: 1>}, {transform_indices = @transform_1, window_bounds = array<i64: 16, 128>}, {transform_indices = @transform_2, window_bounds = array<i64: 16, 128>}]} {
    %c16_i32 = arith.constant 16 : i32
    %0 = arith.muli %arg0, %c16_i32 : i32
    %1 = tpu.iota {dimensions = array<i32: 0>} : vector<16x128xi32>
    %2 = vector.broadcast %0 : i32 to vector<16x128xi32>
    %3 = arith.addi %1, %2 : vector<16x128xi32>
    %4 = tpu.iota {dimensions = array<i32: 1>} : vector<16x128xi32>
    %c128_i32 = arith.constant 128 : i32
    %5 = vector.broadcast %c128_i32 : i32 to vector<16x128xi32>
    %6 = arith.muli %3, %5 : vector<16x128xi32>
    %7 = arith.addi %6, %4 : vector<16x128xi32>
    %c0 = arith.constant 0 : index
    %8 = memref.load %arg1[%c0] : memref<1xi32, #tpu.memory_space<smem>>
    %c16_i32_0 = arith.constant 16 : i32
    %9 = arith.shrsi %8, %c16_i32_0 : i32
    %c65535_i32 = arith.constant 65535 : i32
    %10 = arith.andi %9, %c65535_i32 : i32
    %11 = arith.xori %8, %10 : i32
    %c2145916205_i32 = arith.constant 2145916205 : i32
    %12 = arith.muli %11, %c2145916205_i32 : i32
    %c15_i32 = arith.constant 15 : i32
    %13 = arith.shrsi %12, %c15_i32 : i32
    %c131071_i32 = arith.constant 131071 : i32
    %14 = arith.andi %13, %c131071_i32 : i32
    %15 = arith.xori %12, %14 : i32
    %c-2073188725_i32 = arith.constant -2073188725 : i32
    %16 = arith.muli %15, %c-2073188725_i32 : i32
    %c16_i32_1 = arith.constant 16 : i32
    %17 = arith.shrsi %16, %c16_i32_1 : i32
    %c65535_i32_2 = arith.constant 65535 : i32
    %18 = arith.andi %17, %c65535_i32_2 : i32
    %19 = arith.xori %16, %18 : i32
    %20 = vector.broadcast %19 : i32 to vector<16x128xi32>
    %21 = arith.xori %7, %20 : vector<16x128xi32>
    %c16_i32_3 = arith.constant 16 : i32
    %22 = vector.broadcast %c16_i32_3 : i32 to vector<16x128xi32>
    %23 = arith.shrsi %21, %22 : vector<16x128xi32>
    %c65535_i32_4 = arith.constant 65535 : i32
    %24 = vector.broadcast %c65535_i32_4 : i32 to vector<16x128xi32>
    %25 = arith.andi %23, %24 : vector<16x128xi32>
    %26 = arith.xori %21, %25 : vector<16x128xi32>
    %c2145916205_i32_5 = arith.constant 2145916205 : i32
    %27 = vector.broadcast %c2145916205_i32_5 : i32 to vector<16x128xi32>
    %28 = arith.muli %26, %27 : vector<16x128xi32>
    %c15_i32_6 = arith.constant 15 : i32
    %29 = vector.broadcast %c15_i32_6 : i32 to vector<16x128xi32>
    %30 = arith.shrsi %28, %29 : vector<16x128xi32>
    %c131071_i32_7 = arith.constant 131071 : i32
    %31 = vector.broadcast %c131071_i32_7 : i32 to vector<16x128xi32>
    %32 = arith.andi %30, %31 : vector<16x128xi32>
    %33 = arith.xori %28, %32 : vector<16x128xi32>
    %c-2073188725_i32_8 = arith.constant -2073188725 : i32
    %34 = vector.broadcast %c-2073188725_i32_8 : i32 to vector<16x128xi32>
    %35 = arith.muli %33, %34 : vector<16x128xi32>
    %c16_i32_9 = arith.constant 16 : i32
    %36 = vector.broadcast %c16_i32_9 : i32 to vector<16x128xi32>
    %37 = arith.shrsi %35, %36 : vector<16x128xi32>
    %c65535_i32_10 = arith.constant 65535 : i32
    %38 = vector.broadcast %c65535_i32_10 : i32 to vector<16x128xi32>
    %39 = arith.andi %37, %38 : vector<16x128xi32>
    %40 = arith.xori %35, %39 : vector<16x128xi32>
    %c1297109143_i32 = arith.constant 1297109143 : i32
    %41 = vector.broadcast %c1297109143_i32 : i32 to vector<16x128xi32>
    %42 = arith.xori %40, %41 : vector<16x128xi32>
    %c16_i32_11 = arith.constant 16 : i32
    %43 = vector.broadcast %c16_i32_11 : i32 to vector<16x128xi32>
    %44 = arith.shrsi %42, %43 : vector<16x128xi32>
    %c65535_i32_12 = arith.constant 65535 : i32
    %45 = vector.broadcast %c65535_i32_12 : i32 to vector<16x128xi32>
    %46 = arith.andi %44, %45 : vector<16x128xi32>
    %47 = arith.xori %42, %46 : vector<16x128xi32>
    %c2145916205_i32_13 = arith.constant 2145916205 : i32
    %48 = vector.broadcast %c2145916205_i32_13 : i32 to vector<16x128xi32>
    %49 = arith.muli %47, %48 : vector<16x128xi32>
    %c15_i32_14 = arith.constant 15 : i32
    %50 = vector.broadcast %c15_i32_14 : i32 to vector<16x128xi32>
    %51 = arith.shrsi %49, %50 : vector<16x128xi32>
    %c131071_i32_15 = arith.constant 131071 : i32
    %52 = vector.broadcast %c131071_i32_15 : i32 to vector<16x128xi32>
    %53 = arith.andi %51, %52 : vector<16x128xi32>
    %54 = arith.xori %49, %53 : vector<16x128xi32>
    %c-2073188725_i32_16 = arith.constant -2073188725 : i32
    %55 = vector.broadcast %c-2073188725_i32_16 : i32 to vector<16x128xi32>
    %56 = arith.muli %54, %55 : vector<16x128xi32>
    %c16_i32_17 = arith.constant 16 : i32
    %57 = vector.broadcast %c16_i32_17 : i32 to vector<16x128xi32>
    %58 = arith.shrsi %56, %57 : vector<16x128xi32>
    %c65535_i32_18 = arith.constant 65535 : i32
    %59 = vector.broadcast %c65535_i32_18 : i32 to vector<16x128xi32>
    %60 = arith.andi %58, %59 : vector<16x128xi32>
    %61 = arith.xori %56, %60 : vector<16x128xi32>
    %c8_i32 = arith.constant 8 : i32
    %62 = vector.broadcast %c8_i32 : i32 to vector<16x128xi32>
    %63 = arith.shrsi %61, %62 : vector<16x128xi32>
    %c16777215_i32 = arith.constant 16777215 : i32
    %64 = vector.broadcast %c16777215_i32 : i32 to vector<16x128xi32>
    %65 = arith.andi %63, %64 : vector<16x128xi32>
    %66 = arith.sitofp %65 : vector<16x128xi32> to vector<16x128xf32>
    %cst = arith.constant 1.000000e+00 : f32
    %67 = vector.broadcast %cst : f32 to vector<16x128xf32>
    %68 = arith.addf %66, %67 : vector<16x128xf32>
    %cst_19 = arith.constant 5.96046448E-8 : f32
    %69 = vector.broadcast %cst_19 : f32 to vector<16x128xf32>
    %70 = arith.mulf %68, %69 : vector<16x128xf32>
    %c2027808487_i32 = arith.constant 2027808487 : i32
    %71 = vector.broadcast %c2027808487_i32 : i32 to vector<16x128xi32>
    %72 = arith.xori %40, %71 : vector<16x128xi32>
    %c16_i32_20 = arith.constant 16 : i32
    %73 = vector.broadcast %c16_i32_20 : i32 to vector<16x128xi32>
    %74 = arith.shrsi %72, %73 : vector<16x128xi32>
    %c65535_i32_21 = arith.constant 65535 : i32
    %75 = vector.broadcast %c65535_i32_21 : i32 to vector<16x128xi32>
    %76 = arith.andi %74, %75 : vector<16x128xi32>
    %77 = arith.xori %72, %76 : vector<16x128xi32>
    %c2145916205_i32_22 = arith.constant 2145916205 : i32
    %78 = vector.broadcast %c2145916205_i32_22 : i32 to vector<16x128xi32>
    %79 = arith.muli %77, %78 : vector<16x128xi32>
    %c15_i32_23 = arith.constant 15 : i32
    %80 = vector.broadcast %c15_i32_23 : i32 to vector<16x128xi32>
    %81 = arith.shrsi %79, %80 : vector<16x128xi32>
    %c131071_i32_24 = arith.constant 131071 : i32
    %82 = vector.broadcast %c131071_i32_24 : i32 to vector<16x128xi32>
    %83 = arith.andi %81, %82 : vector<16x128xi32>
    %84 = arith.xori %79, %83 : vector<16x128xi32>
    %c-2073188725_i32_25 = arith.constant -2073188725 : i32
    %85 = vector.broadcast %c-2073188725_i32_25 : i32 to vector<16x128xi32>
    %86 = arith.muli %84, %85 : vector<16x128xi32>
    %c16_i32_26 = arith.constant 16 : i32
    %87 = vector.broadcast %c16_i32_26 : i32 to vector<16x128xi32>
    %88 = arith.shrsi %86, %87 : vector<16x128xi32>
    %c65535_i32_27 = arith.constant 65535 : i32
    %89 = vector.broadcast %c65535_i32_27 : i32 to vector<16x128xi32>
    %90 = arith.andi %88, %89 : vector<16x128xi32>
    %91 = arith.xori %86, %90 : vector<16x128xi32>
    %c8_i32_28 = arith.constant 8 : i32
    %92 = vector.broadcast %c8_i32_28 : i32 to vector<16x128xi32>
    %93 = arith.shrsi %91, %92 : vector<16x128xi32>
    %c16777215_i32_29 = arith.constant 16777215 : i32
    %94 = vector.broadcast %c16777215_i32_29 : i32 to vector<16x128xi32>
    %95 = arith.andi %93, %94 : vector<16x128xi32>
    %96 = arith.sitofp %95 : vector<16x128xi32> to vector<16x128xf32>
    %cst_30 = arith.constant 1.000000e+00 : f32
    %97 = vector.broadcast %cst_30 : f32 to vector<16x128xf32>
    %98 = arith.addf %96, %97 : vector<16x128xf32>
    %cst_31 = arith.constant 5.96046448E-8 : f32
    %99 = vector.broadcast %cst_31 : f32 to vector<16x128xf32>
    %100 = arith.mulf %98, %99 : vector<16x128xf32>
    %101 = math.log %70 : vector<16x128xf32>
    %cst_32 = arith.constant -2.000000e+00 : f32
    %102 = vector.broadcast %cst_32 : f32 to vector<16x128xf32>
    %103 = arith.mulf %102, %101 : vector<16x128xf32>
    %104 = math.sqrt %103 : vector<16x128xf32>
    %cst_33 = arith.constant 6.28318548 : f32
    %105 = vector.broadcast %cst_33 : f32 to vector<16x128xf32>
    %106 = arith.mulf %105, %100 : vector<16x128xf32>
    %107 = math.cos %106 : vector<16x128xf32>
    %108 = arith.mulf %104, %107 : vector<16x128xf32>
    %cst_34 = arith.constant 1.000000e-01 : f32
    %109 = vector.broadcast %cst_34 : f32 to vector<16x128xf32>
    %110 = arith.mulf %108, %109 : vector<16x128xf32>
    %cst_35 = arith.constant 5.000000e-02 : f32
    %111 = vector.broadcast %cst_35 : f32 to vector<16x128xf32>
    %112 = arith.subf %110, %111 : vector<16x128xf32>
    %c0_36 = arith.constant 0 : index
    %c0_37 = arith.constant 0 : index
    %113 = vector.load %arg2[%c0_36, %c0_37] : memref<16x128xf32, #tpu.memory_space<vmem>>, vector<16x128xf32>
    %114 = arith.addf %113, %112 : vector<16x128xf32>
    %c0_38 = arith.constant 0 : index
    %c0_39 = arith.constant 0 : index
    %115 = vector.load %arg3[%c0_38, %c0_39] : memref<16x128xf32, #tpu.memory_space<vmem>>, vector<16x128xf32>
    tpu.vector_store %arg3[%c0_38, %c0_39], %114 {strides = array<i32>} : memref<16x128xf32, #tpu.memory_space<vmem>>, vector<16x128xf32>,
    return
  }
  func.func @transform_0(%arg0: i32) -> i32 {
    %c0_i32 = arith.constant 0 : i32
    %c0_i32_0 = arith.constant 0 : i32
    return %c0_i32 : i32
  }
  func.func @transform_1(%arg0: i32) -> (i32, i32) {
    %c0_i32 = arith.constant 0 : i32
    %c0_i32_0 = arith.constant 0 : i32
    return %arg0, %c0_i32 : i32, i32
  }
  func.func @transform_2(%arg0: i32) -> (i32, i32) {
    %c0_i32 = arith.constant 0 : i32
    %c0_i32_0 = arith.constant 0 : i32
    return %arg0, %c0_i32 : i32, i32
  }
}

</mosaic_0001>

<bundles_post_ra>
// kernel: tpu_custom_call.1
= control target key start
LH: loop header
LB: loop body
LE: loop exit
PB: predicated region body
PF: predicated region fallthrough
CT: control target
= control target key end

     0   :  { %8 = vsyncpa [#allocation4], 0  ;;  %s678_s0 = inlined_call_operand.<no memory space> [shape: s32[1], index: 0, kind: input, shape index: {}]   ;;  %s679_s1 = inlined_call_operand.hbm [shape: f32[16,128], index: 1, kind: input, shape index: {}, may-alias: {1,2}]   ;;  %s680_s2 = inlined_call_operand.hbm [shape: f32[16,128], index: 2, kind: output, shape index: {}, may-alias: {1,2}]  }
   0x1   :  { %9 = vsyncpa [#allocation5], 0  ;;  %s516_s9 = smov [#allocation3]   ;;  %s468_s13 = scalar_lea.hbm %s679_s1, 256 }
   0x2   :  { %s17_s10 = sshll.u32 %s516_s9, 4  ;;  %p469_p0 = scmp.ne.s32.totalorder %s679_s1, %s468_s13  ;;  %s18_s10 = int_to_ptr.vmem [resolvable:$true] %s17_s10 }
   0x3   :  { %p472_p1 = scmp.lt.u32.totalorder %s468_s13, %s679_s1 }
   0x5   :  { %p474_p2 = pnand %p472_p1, %p469_p0 }
   0x7   :  { %477 = shalt.err (!%p474_p2)
}
   0x8   :  { %s478_s18 = scalar_lea.vmem %s18_s10, 256  ;;  %p483_p4 = scmp.lt.s32.totalorder %s18_s10, %s18_s10 }
   0x9   :  { %p479_p3 = scmp.ne.s32.totalorder %s18_s10, %s478_s18  ;;  %p484_p5 = scmp.lt.s32.totalorder %s478_s18, %s478_s18 }
   0xb   :  { %p485_p6 = por %p484_p5, %p483_p4 }
   0xd   :  { %p486_p7 = pnand %p485_p6, %p479_p3 }
   0xf   :  { %489 = shalt.err (!%p486_p7)
}
  0x10   :  { %s517_s19 = smov 128   ;;  %s518_s20 = smov 8  }
  0x11   :  { %23 = dma.hbm_to_vmem [thread:$0]  %s679_s1, 256, %s18_s10, [#allocation4], %s517_s19, %s517_s19, %s518_s20  }
  0x12   :  { %512 = dma.done.wait [#allocation4], 256  }
  0x13   :  { %513 = vsyncadd [#allocation4], 4294967040  ;;  %v28_v0 = vlaneseq  ;;  %s41_s25 = sshra.s32 %s678_s0, 16 }
  0x14   :  { %s42_s26 = sand.u32 65535, %s41_s25 }
  0x15   :  { %v29_v1 = vshrl.u32 %v28_v0, 7  ;;  %s43_s29 = sxor.u32 %s42_s26, %s678_s0  ;;  %v35_v3 = vand.u32 127, %v28_v0  ;;  %s525_s0 = smov [#allocation6]  }
  0x16   :  { %s44_s30 = smul.u32 2145916205, %s43_s29  ;;  %s390_s9 = sshll.u32 %s525_s0, 4  ;;  %s391_s9 = int_to_ptr.vmem [resolvable:$true] %s390_s9 }
  0x17   :  { %v30_v2 = vadd.s32 8, %v29_v1  ;;  %v36_v4 = vmul.u32 128, %v29_v1  ;;  %s490_s10 = scalar_lea.vmem %s391_s9, 256  ;;  %p495_p9 = scmp.lt.s32.totalorder %s391_s9, %s391_s9 }
  0x18   :  { %s45_s3 = sshra.s32 %s44_s30, 15  ;;  %p491_p8 = scmp.ne.s32.totalorder %s391_s9, %s490_s10 }
  0x19   :  { %v37_v5 = vmul.u32 128, %v30_v2  ;;  %s46_s1 = sand.u32 131071, %s45_s3  ;;  %v38_v6 = vadd.s32 %v36_v4, %v35_v3  ;;  %p496_p10 = scmp.lt.s32.totalorder %s490_s10, %s490_s10 }
  0x1a   :  { %s47_s4 = sxor.u32 %s46_s1, %s44_s30 }
  0x1b   :  { %s48_s5 = smul.u32 2221778571, %s47_s4  ;;  %v39_v7 = vadd.s32 %v37_v5, %v35_v3  ;;  %p497_p11 = por %p496_p10, %p495_p9 }
  0x1d   :  { %s49_s6 = sshra.s32 %s48_s5, 16  ;;  %p498_p12 = pnand %p497_p11, %p491_p8 }
  0x1e   :  { %s50_s7 = sand.u32 65535, %s49_s6 }
  0x1f   :  { %s51_s8 = sxor.u32 %s50_s7, %s48_s5 }
  0x20   :  { %v52_v8 = vstv %s51_s8 }
  0x21   :  { %v53_v9 = vxor.u32 %v52_v8, %v38_v6  ;;  %v54_v10 = vxor.u32 %v52_v8, %v39_v7 }
  0x23   :  { %v402_v11 = vshrl.u32 %v53_v9, 16  ;;  %v403_v12 = vshrl.u32 %v54_v10, 16 }
  0x25   :  { %v59_v13 = vxor.u32 %v402_v11, %v53_v9  ;;  %v60_v14 = vxor.u32 %v403_v12, %v54_v10 }
  0x27   :  { %v61_v15 = vmul.u32 2145916205, %v59_v13  ;;  %v62_v16 = vmul.u32 2145916205, %v60_v14 }
  0x29   :  { %v404_v17 = vshrl.u32 %v61_v15, 15  ;;  %v405_v18 = vshrl.u32 %v62_v16, 15 }
  0x2b   :  { %v67_v19 = vxor.u32 %v404_v17, %v61_v15  ;;  %v68_v20 = vxor.u32 %v405_v18, %v62_v16 }
  0x2d   :  { %v69_v21 = vmul.u32 2221778571, %v67_v19  ;;  %v70_v22 = vmul.u32 2221778571, %v68_v20 }
  0x2f   :  { %v406_v23 = vshrl.u32 %v69_v21, 16  ;;  %v407_v24 = vshrl.u32 %v70_v22, 16 }
  0x31   :  { %v75_v25 = vxor.u32 %v406_v23, %v69_v21  ;;  %v76_v26 = vxor.u32 %v407_v24, %v70_v22 }
  0x33   :  { %v111_v27 = vxor.u32 2027808487, %v75_v25  ;;  %v112_v28 = vxor.u32 2027808487, %v76_v26  ;;  %v77_v29 = vxor.u32 1297109143, %v75_v25 }
  0x34   :  { %v78_v39 = vxor.u32 1297109143, %v76_v26 }
  0x35   :  { %v416_v30 = vshrl.u32 %v111_v27, 16  ;;  %v417_v31 = vshrl.u32 %v112_v28, 16  ;;  %v408_v34 = vshrl.u32 %v77_v29, 16 }
  0x36   :  { %v409_v45 = vshrl.u32 %v78_v39, 16 }
  0x37   :  { %v117_v32 = vxor.u32 %v416_v30, %v111_v27  ;;  %v118_v33 = vxor.u32 %v417_v31, %v112_v28  ;;  %v83_v40 = vxor.u32 %v408_v34, %v77_v29  ;;  %v519_v28 = vmov 683565275  }
  0x38   :  { %v84_v51 = vxor.u32 %v409_v45, %v78_v39  ;;  %v520_v30 = vmov 2475754826   ;;  %v522_v34 = vmov 2102212464  }
  0x39   :  { %v119_v35 = vmul.u32 2145916205, %v117_v32  ;;  %v120_v36 = vmul.u32 2145916205, %v118_v33  ;;  %v521_v32 = vmov 2131351028  }
  0x3a   :  { %v85_v46 = vmul.u32 2145916205, %v83_v40  ;;  %v86_v57 = vmul.u32 2145916205, %v84_v51 }
  0x3b   :  { %v418_v37 = vshrl.u32 %v119_v35, 15  ;;  %v419_v38 = vshrl.u32 %v120_v36, 15 }
  0x3c   :  { %v410_v52 = vshrl.u32 %v85_v46, 15  ;;  %v411_v63 = vshrl.u32 %v86_v57, 15 }
  0x3d   :  { %v125_v41 = vxor.u32 %v418_v37, %v119_v35  ;;  %v126_v42 = vxor.u32 %v419_v38, %v120_v36  ;;  %v523_v36 = vmov 920167782  }
  0x3e   :  { %v91_v58 = vxor.u32 %v410_v52, %v85_v46  ;;  %v92_v4 = vxor.u32 %v411_v63, %v86_v57  ;;  %v524_v46 = vmov 1326507024  }
  0x3f   :  { %v127_v43 = vmul.u32 2221778571, %v125_v41  ;;  %v128_v44 = vmul.u32 2221778571, %v126_v42 }
  0x40   :  { %v93_v0 = vmul.u32 2221778571, %v91_v58  ;;  %v94_v11 = vmul.u32 2221778571, %v92_v4 }
  0x41   :  { %v420_v47 = vshrl.u32 %v127_v43, 16  ;;  %v421_v48 = vshrl.u32 %v128_v44, 16 }
  0x42   :  { %v412_v5 = vshrl.u32 %v93_v0, 16  ;;  %v413_v17 = vshrl.u32 %v94_v11, 16 }
  0x43   :  { %v133_v49 = vxor.u32 %v420_v47, %v127_v43  ;;  %v134_v50 = vxor.u32 %v421_v48, %v128_v44 }
  0x44   :  { %v99_v12 = vxor.u32 %v412_v5, %v93_v0  ;;  %v572_v24 = vxor.u32 %v413_v17, %v94_v11 }
  0x45   :  { %v422_v53 = vshrl.u32 %v133_v49, 8  ;;  %v423_v54 = vshrl.u32 %v134_v50, 8 }
  0x46   :  { %v414_v18 = vshrl.u32 %v99_v12, 8 }
  0x47   :  { %v139_v55 = vcvt.s32.f32 %v422_v53  ;;  %v140_v56 = vcvt.s32.f32 %v423_v54 }
  0x48   :  { %v105_v25 = vcvt.s32.f32 %v414_v18 }
  0x49   :  { %v141_v59 = vadd.f32 1.0, %v139_v55  ;;  %v142_v60 = vadd.f32 1.0, %v140_v56 }
  0x4b   :  { %v143_v61 = vmul.f32 5.9604645e-08, %v141_v59  ;;  %v144_v62 = vmul.f32 5.9604645e-08, %v142_v60 }
  0x4d   :  { %v562_v1 = vmul.f32 6.2831855, %v143_v61  ;;  %v564_v2 = vmul.f32 6.2831855, %v144_v62 }
  0x4f   :  { %v170_v3 = vand.u32 2139095040, %v562_v1  ;;  %v273_v6 = vand.u32 2139095040, %v564_v2  ;;  %v167_v9 = vand.u32 2147483647, %v562_v1  ;;  %v270_v21 = vand.u32 2147483647, %v564_v2 }
  0x50   :  { %vm169_vm14 = vcmp.lt.s32.totalorder %v562_v1, 0 }
  0x51   :  { %v171_v7 = vshrl.u32 %v170_v3, 23  ;;  %v274_v8 = vshrl.u32 %v273_v6, 23  ;;  %v174_v16 = vand.u32 8388607, %v167_v9  ;;  %v277_v38 = vand.u32 8388607, %v270_v21 }
  0x52   :  { %vm629_vm15 = vcmp.le.f32.partialorder %v167_v9, 0.7853982 }
  0x53   :  { %v424_v10 = vadd.s32 4294967169, %v171_v7  ;;  %v428_v13 = vadd.s32 4294967169, %v274_v8  ;;  %v175_v22 = vor.u32 8388608, %v174_v16  ;;  %v278_v59 = vor.u32 8388608, %v277_v38 }
  0x54   :  { %v107_v7 = vadd.f32 1.0, %v105_v25 }
  0x55   :  { %v177_v14 = vadd.s32 1, %v424_v10  ;;  %v280_v15 = vadd.s32 1, %v428_v13  ;;  %v576_v43 = vshll.u32 %v175_v22, 8 }
  0x57   :  { %vm178_vm0 = vcmp.gt.s32.totalorder %v177_v14, 0  ;;  %vm281_vm1 = vcmp.gt.s32.totalorder %v280_v15, 0 }
  0x58   :  { %v179_v19 = vsel %vm178_vm0, %v177_v14, 0  ;;  %v282_v23 = vsel %vm281_vm1, %v280_v15, 0  ;;  %vm272_vm0 = vcmp.lt.s32.totalorder %v564_v2, 0 }
  0x59   :  { %v181_v20 = vand.u32 31, %v179_v19  ;;  %v180_v26 = vshrl.u32 %v179_v19, 5  ;;  %v284_v39 = vand.u32 31, %v282_v23  ;;  %v283_v11 = vshrl.u32 %v282_v23, 5 }
  0x5a   :  { %v318_v19 = vshll.u32 %v278_v59, 8 }
  0x5b   :  { %v182_v27 = vsub.s32 32, %v181_v20  ;;  %v184_v29 = vshll.u32 %v519_v28, %v181_v20  ;;  %v187_v31 = vshll.u32 %v520_v30, %v181_v20  ;;  %v190_v33 = vshll.u32 %v521_v32, %v181_v20 }
  0x5c   :  { %v193_v35 = vshll.u32 %v522_v34, %v181_v20  ;;  %v196_v37 = vshll.u32 %v523_v36, %v181_v20  ;;  %vm199_vm2 = vcmp.lt.s32.totalorder %v180_v26, 1  ;;  %vm202_vm3 = vcmp.lt.s32.totalorder %v180_v26, 4 }
  0x5d   :  { %v185_v40 = vshrl.u32 %v520_v30, %v182_v27  ;;  %v188_v41 = vshrl.u32 %v521_v32, %v182_v27  ;;  %v191_v42 = vshrl.u32 %v522_v34, %v182_v27  ;;  %v183_v44 = vshrl.u32 %v519_v28, %v182_v27 }
  0x5e   :  { %v194_v45 = vshrl.u32 %v523_v36, %v182_v27  ;;  %v197_v47 = vshrl.u32 %v524_v46, %v182_v27  ;;  %vm201_vm4 = vcmp.lt.s32.totalorder %v180_v26, 3  ;;  %v285_v53 = vsub.s32 32, %v284_v39 }
  0x5f   :  { %v186_v48 = vor.u32 %v185_v40, %v184_v29  ;;  %v189_v49 = vor.u32 %v188_v41, %v187_v31  ;;  %v192_v50 = vor.u32 %v191_v42, %v190_v33  ;;  %vm200_vm5 = vcmp.lt.s32.totalorder %v180_v26, 2 }
  0x60   :  { %v195_v51 = vor.u32 %v194_v45, %v193_v35  ;;  %v198_v52 = vor.u32 %v197_v47, %v196_v37  ;;  %v287_v60 = vshll.u32 %v519_v28, %v284_v39  ;;  %v288_v5 = vshrl.u32 %v520_v30, %v285_v53 }
  0x61   :  { %v204_v54 = vsel %vm202_vm3, %v192_v50, 2102212464  ;;  %v207_v55 = vsel %vm199_vm2, %v186_v48, %v189_v49  ;;  %v211_v56 = vsel %vm199_vm2, %v189_v49, %v192_v50  ;;  %v203_v61 = vsel %vm199_vm2, %v183_v44, %v186_v48 }
  0x62   :  { %v208_v57 = vsel %vm202_vm3, %v195_v51, 920167782  ;;  %v212_v58 = vsel %vm202_vm3, %v198_v52, 1326507024  ;;  %v205_v62 = vsel %vm201_vm4, %v189_v49, %v204_v54  ;;  %v290_v6 = vshll.u32 %v520_v30, %v284_v39 }
  0x63   :  { %v209_v63 = vsel %vm201_vm4, %v192_v50, %v208_v57  ;;  %v213_v0 = vsel %vm201_vm4, %v195_v51, %v212_v58  ;;  %v206_v12 = vsel %vm200_vm5, %v203_v61, %v205_v62  ;;  %v291_v15 = vshrl.u32 %v521_v32, %v285_v53 }
  0x64   :  { %v210_v3 = vsel %vm200_vm5, %v207_v55, %v209_v63  ;;  %v214_v4 = vsel %vm200_vm5, %v211_v56, %v213_v0  ;;  %v286_v16 = vshrl.u32 %v519_v28, %v285_v53  ;;  %v293_v17 = vshll.u32 %v521_v32, %v284_v39 }
  0x65   :  { %v584_v8 = vmul.u32.u64.low %v576_v43, %v214_v4  ;;  %v585_v10 = vmul.u32.u64.high %v576_v43, %v214_v4, %v584_v8  ;;  %v589_v13 = vmul.u32.u64.low %v576_v43, %v210_v3  ;;  %v590_v14 = vmul.u32.u64.high %v576_v43, %v210_v3, %v589_v13 }
  0x66   :  { %v294_v18 = vshrl.u32 %v522_v34, %v285_v53  ;;  %v289_v20 = vor.u32 %v288_v5, %v287_v60  ;;  %v292_v22 = vor.u32 %v291_v15, %v290_v6  ;;  %v296_v25 = vshll.u32 %v522_v34, %v284_v39 }
  0x67   :  { %v297_v27 = vshrl.u32 %v523_v36, %v285_v53  ;;  %v222_v29 = vmul.u32 %v576_v43, %v206_v12  ;;  %vm224_vm6 = vc.u32 %v585_v10, %v589_v13  ;;  %v299_v26 = vshll.u32 %v523_v36, %v284_v39 }
  0x68   :  { %v295_v23 = vor.u32 %v294_v18, %v293_v17  ;;  %v225_v30 = vadd.s32 1, %v590_v14  ;;  %v300_v33 = vshrl.u32 %v524_v46, %v285_v53  ;;  %vm302_vm7 = vcmp.lt.s32.totalorder %v283_v11, 1 }
  0x69   :  { %v298_v31 = vor.u32 %v297_v27, %v296_v25  ;;  %vm303_vm8 = vcmp.lt.s32.totalorder %v283_v11, 2  ;;  %vm304_vm9 = vcmp.lt.s32.totalorder %v283_v11, 3  ;;  %vm305_vm10 = vcmp.lt.s32.totalorder %v283_v11, 4 }
  0x6a   :  { %v306_v28 = vsel %vm302_vm7, %v286_v16, %v289_v20  ;;  %v226_v32 = vsel %vm224_vm6, %v225_v30, %v590_v14  ;;  %v301_v34 = vor.u32 %v300_v33, %v299_v26  ;;  %v307_v35 = vsel %vm305_vm10, %v295_v23, 2102212464 }
  0x6b   :  { %v310_v37 = vsel %vm302_vm7, %v289_v20, %v292_v22  ;;  %v227_v38 = vadd.s32 %v226_v32, %v222_v29  ;;  %v308_v40 = vsel %vm304_vm9, %v292_v22, %v307_v35  ;;  %v311_v41 = vsel %vm305_vm10, %v298_v31, 920167782 }
  0x6c   :  { %v314_v42 = vsel %vm302_vm7, %v292_v22, %v295_v23  ;;  %v312_v36 = vsel %vm304_vm9, %v295_v23, %v311_v41  ;;  %v315_v39 = vsel %vm305_vm10, %v301_v34, 1326507024  ;;  %v415_v43 = vshrl.u32 %v572_v24, 8 }
  0x6d   :  { %v228_v44 = vadd.s32 536870912, %v227_v38  ;;  %v313_v45 = vsel %vm303_vm8, %v310_v37, %v312_v36  ;;  %v316_v46 = vsel %vm304_vm9, %v298_v31, %v315_v39  ;;  %v309_v47 = vsel %vm303_vm8, %v306_v28, %v308_v40 }
  0x6e   :  { %v317_v48 = vsel %vm303_vm8, %v314_v42, %v316_v46  ;;  %v605_v49 = vmul.u32.u64.low %v318_v19, %v313_v45  ;;  %v606_v50 = vmul.u32.u64.high %v318_v19, %v313_v45, %v605_v49  ;;  %v109_v51 = vmul.f32 5.9604645e-08, %v107_v7 }
  0x6f   :  { %v608_v52 = vshrl.u32 %v228_v44, 30  ;;  %v610_v53 = vmul.u32.u64.low %v318_v19, %v317_v48  ;;  %v611_v54 = vmul.u32.u64.high %v318_v19, %v317_v48, %v610_v53  ;;  %v325_v55 = vmul.u32 %v318_v19, %v309_v47 }
  0x70   :  { %v328_v56 = vadd.s32 1, %v606_v50  ;;  %v106_v57 = vcvt.s32.f32 %v415_v43  ;;  %452 = vlog2.f32 %v109_v51  ;;  %v223_v11 = vadd.s32 %v589_v13, %v585_v10 }
  0x71   :  { %v230_v24 = vshll.u32 %v608_v52, 30  ;;  %vm327_vm11 = vc.u32 %v611_v54, %v605_v49  ;;  %v326_v33 = vadd.s32 %v605_v49, %v611_v54  ;;  %v253_v42 = vsub.s32 4, %v608_v52 }
  0x72   :  { %v329_v59 = vsel %vm327_vm11, %v328_v56, %v606_v50  ;;  %v108_v62 = vadd.f32 1.0, %v106_v57  ;;  %vm645_vm2 = vcmp.le.f32.partialorder %v270_v21, 0.7853982  ;;  %vm259_vm7 = vweird.f32 %v562_v1 }
  0x73   :  { %v231_v58 = vsub.s32 %v227_v38, %v230_v24  ;;  %v330_v61 = vadd.s32 %v329_v59, %v325_v55  ;;  %v254_v48 = vsel %vm169_vm14, %v253_v42, %v608_v52 }
  0x74   :  { %v110_v5 = vmul.f32 5.9604645e-08, %v108_v62  ;;  %v256_v53 = vsel %vm629_vm15, 0, %v254_v48 }
  0x75   :  { %v233_v60 = vsub.s32 0, %v231_v58  ;;  %v331_v0 = vadd.s32 536870912, %v330_v61  ;;  %v260_v56 = vand.u32 3, %v256_v53 }
  0x76   :  { %454 = vlog2.f32 %v110_v5 }
  0x77   :  { %v425_v63 = vmin.u32 %v233_v60, %v231_v58  ;;  %v617_v4 = vshrl.u32 %v331_v0, 30  ;;  %vm265_vm4 = vcmp.eq.s32.totalorder %v260_v56, 2  ;;  %vm262_vm5 = vcmp.eq.s32.totalorder %v260_v56, 0 }
  0x78   :  { %vm261_vm6 = vcmp.lt.s32.totalorder %v260_v56, 2 }
  0x79   :  { %v235_v3 = vclz %v425_v63  ;;  %v333_v7 = vshll.u32 %v617_v4, 30 }
  0x7a   :  { %v453_v8 = vpop.eup %452 }
  0x7b   :  { %v426_v6 = vadd.s32 4294967294, %v235_v3  ;;  %v334_v14 = vsub.s32 %v330_v61, %v333_v7  ;;  %v146_v18 = vmul.f32 0.6931472, %v453_v8 }
  0x7d   :  { %vm427_vm12 = vcmp.lt.s32.totalorder %v426_v6, 0  ;;  %v336_v19 = vsub.s32 0, %v334_v14  ;;  %v622_v23 = vmul.f32 -2.0, %v146_v18 }
  0x7e   :  { %v238_v12 = vsel %vm427_vm12, 0, %v426_v6 }
  0x7f   :  { %v239_v15 = vsub.s32 32, %v238_v12  ;;  %v240_v16 = vshll.u32 %v231_v58, %v238_v12  ;;  %v243_v17 = vsub.s32 4294967266, %v238_v12  ;;  %v429_v25 = vmin.u32 %v336_v19, %v334_v14  ;;  %v379_v19 = vld [vmem:[#allocation3] sm:$0xff] }
  0x80   :  { %456 = vrsqrt.f32 %v622_v23  ;;  %v455_v28 = vpop.eup %454  ;;  %vm153_vm1 = vcmp.eq.f32.partialorder %v622_v23, inf  ;;  %v356_v58 = vsub.s32 4, %v617_v4  ;;  %vm155_vm3 = vcmp.eq.f32.partialorder %v622_v23, 0.0 }
  0x81   :  { %v241_v20 = vshrl.u32 %v223_v11, %v239_v15  ;;  %v244_v22 = vadd.s32 127, %v243_v17  ;;  %v338_v26 = vclz %v429_v25  ;;  %v148_v36 = vmul.f32 0.6931472, %v455_v28 }
  0x82   :  { %v156_v62 = vand.u32 2147483648, %v622_v23  ;;  %v357_v3 = vsel %vm272_vm0, %v356_v58, %v617_v4 }
  0x83   :  { %v242_v27 = vor.u32 %v241_v20, %v240_v16  ;;  %v245_v29 = vshll.u32 %v244_v22, 23  ;;  %v430_v10 = vadd.s32 4294967294, %v338_v26  ;;  %v150_v9 = vmul.f32 -2.0, %v148_v36 }
  0x84   :  { %v359_v11 = vsel %vm645_vm2, 0, %v357_v3 }
  0x85   :  { %v246_v30 = vor.u32 4788187, %v245_v29  ;;  %v249_v31 = vcvt.s32.f32 %v242_v27  ;;  %vm431_vm13 = vcmp.lt.s32.totalorder %v430_v10, 0  ;;  %v363_v16 = vand.u32 3, %v359_v11 }
  0x86   :  { %v341_v34 = vsel %vm431_vm13, 0, %v430_v10  ;;  %vm160_vm8 = vcmp.eq.f32.partialorder %v150_v9, inf  ;;  %v163_v22 = vand.u32 2147483648, %v150_v9  ;;  %vm162_vm10 = vcmp.eq.f32.partialorder %v150_v9, 0.0 }
  0x87   :  { %v247_v13 = vand.u32 2147483647, %v246_v30  ;;  %v342_v35 = vsub.s32 32, %v341_v34  ;;  %v343_v37 = vshll.u32 %v334_v14, %v341_v34  ;;  %v346_v38 = vsub.s32 4294967266, %v341_v34  ;;  %v380_v34 = vld [vmem:[#allocation3 + $0x8] sm:$0xff] }
  0x88   :  { %vm368_vm9 = vcmp.eq.s32.totalorder %v363_v16, 2  ;;  %vm365_vm11 = vcmp.eq.s32.totalorder %v363_v16, 0  ;;  %vm364_vm12 = vcmp.lt.s32.totalorder %v363_v16, 2  ;;  %vm362_vm13 = vweird.f32 %v564_v2 }
  0x89   :  { %v250_v32 = vmul.f32 %v249_v31, %v247_v13  ;;  %v344_v39 = vshrl.u32 %v326_v33, %v342_v35  ;;  %v347_v43 = vadd.s32 127, %v346_v38 }
  0x8a   :  { %v457_v51 = vpop.eup %456 }
  0x8b   :  { %v251_v41 = vxor.u32 2147483648, %v250_v32  ;;  %v345_v46 = vor.u32 %v344_v39, %v343_v37  ;;  %v348_v47 = vshll.u32 %v347_v43, 23  ;;  %v152_v55 = vmul.f32 %v457_v51, %v622_v23 }
  0x8d   :  { %v252_v44 = vsel %vm169_vm14, %v251_v41, %v250_v32  ;;  %v349_v49 = vor.u32 4788187, %v348_v47  ;;  %v352_v50 = vcvt.s32.f32 %v345_v46  ;;  %v154_v61 = vsel %vm153_vm1, %v622_v23, %v152_v55 }
  0x8e   :  { %v255_v45 = vsel %vm629_vm15, %v562_v1, %v252_v44  ;;  %v157_v7 = vsel %vm155_vm3, %v156_v62, %v154_v61 }
  0x8f   :  { %458 = vcosq.f32 %v255_v45  ;;  %v350_v54 = vand.u32 2147483647, %v349_v49 }
  0x90   :  { %460 = vsinq.f32 %v255_v45 }
  0x91   :  { %462 = vrsqrt.f32 %v150_v9  ;;  %v353_v24 = vmul.f32 %v352_v50, %v350_v54 }
  0x93   :  { %v354_v57 = vxor.u32 2147483648, %v353_v24 }
  0x95   :  { %v355_v59 = vsel %vm272_vm0, %v354_v57, %v353_v24 }
  0x96   :  { %v358_v63 = vsel %vm645_vm2, %v564_v2, %v355_v59 }
  0x97   :  { %464 = vcosq.f32 %v358_v63 }
  0x98   :  { %466 = vsinq.f32 %v358_v63 }
  0x99   :  { %v459_v60 = vpop.eup %458 }
  0x9a   :  { %v461_v21 = vpop.eup %460  ;;  %v266_v0 = vxor.u32 2147483648, %v459_v60 }
  0x9b   :  { %v263_v5 = vxor.u32 2147483648, %v461_v21  ;;  %v463_v12 = vpop.eup %462 }
  0x9c   :  { %v267_v6 = vsel %vm265_vm4, %v266_v0, %v461_v21  ;;  %v159_v4 = vmul.f32 %v463_v12, %v150_v9 }
  0x9d   :  { %v264_v8 = vsel %vm262_vm5, %v459_v60, %v263_v5 }
  0x9e   :  { %v268_v14 = vsel %vm261_vm6, %v264_v8, %v267_v6  ;;  %v161_v27 = vsel %vm160_vm8, %v150_v9, %v159_v4 }
  0x9f   :  { %v269_v15 = vsel %vm259_vm7, nan, %v268_v14  ;;  %v164_v31 = vsel %vm162_vm10, %v163_v22, %v161_v27 }
  0xa0   :  { %v373_v17 = vmul.f32 %v269_v15, %v157_v7 }
  0xa1   :  { %v465_v20 = vpop.eup %464 }
  0xa2   :  { %v375_v18 = vmul.f32 0.1, %v373_v17  ;;  %v467_v25 = vpop.eup %466  ;;  %v369_v29 = vxor.u32 2147483648, %v465_v20 }
  0xa3   :  { %v366_v23 = vxor.u32 2147483648, %v467_v25 }
  0xa4   :  { %v432_v1 = vadd.f32 -0.05, %v375_v18  ;;  %v370_v30 = vsel %vm368_vm9, %v369_v29, %v467_v25 }
  0xa5   :  { %v367_v10 = vsel %vm365_vm11, %v465_v20, %v366_v23 }
  0xa6   :  { %v381_v26 = vadd.f32 %v432_v1, %v379_v19  ;;  %v371_v13 = vsel %vm364_vm12, %v367_v10, %v370_v30 }
  0xa7   :  { %v372_v33 = vsel %vm362_vm13, nan, %v371_v13 }
  0xa8   :  { %383 = vst [vmem:[#allocation6] sm:$0xff] %v381_v26  ;;  %v374_v28 = vmul.f32 %v372_v33, %v164_v31 }
  0xaa   :  { %v376_v32 = vmul.f32 0.1, %v374_v28 }
  0xac   :  { %v433_v35 = vadd.f32 -0.05, %v376_v32 }
  0xae   :  { %v382_v37 = vadd.f32 %v433_v35, %v380_v34 }
  0xb0   :  { %384 = vst [vmem:[#allocation6 + $0x8] sm:$0xff] %v382_v37 }
  0xb1   :  { %501 = shalt.err (!%p498_p12)
}
  0xb2   :  { %s502_s13 = scalar_lea.hbm %s680_s2, 256 }
  0xb3   :  { %p503_p13 = scmp.ne.s32.totalorder %s680_s2, %s502_s13  ;;  %p506_p0 = scmp.lt.u32.totalorder %s502_s13, %s680_s2 }
  0xb5   :  { %p508_p1 = pnand %p506_p0, %p503_p13 }
  0xb7   :  { %511 = shalt.err (!%p508_p1)
}
  0xb8   :  { %396 = dma.vmem_to_hbm [thread:$0]  %s391_s9, 256, %s680_s2, [#allocation5], %s517_s19, %s517_s19, %s518_s20  }
  0xb9   :  { %514 = dma.done.wait [#allocation5], 256  }
  0xba   :  { %515 = vsyncadd [#allocation5], 4294967040 }
  0xbb   :  { %400 = vsyncpa [#allocation4], 1 }
  0xbc   :  { %401 = vsyncpa [#allocation5], 1 }

</bundles_post_ra>
